<compile_context>
chip_gen: v6e
topology: v6e:2x2x1
jax: 0.10.0
libtpu: 0.0.40
codegen_flags: <defaults>
</compile_context>

<pallas_src>
import math

import jax
import jax.numpy as jnp
from jax.experimental import pallas as pl
from jax.experimental.pallas import tpu as pltpu


def _round_up(x, m):
    return ((x + m - 1) // m) * m


def ffnn_kernel(xT_ref, w1t_ref, b1_ref, w2t_ref, b2_ref, w3_ref, b3_ref, o_ref):
    wt = w1t_ref.dtype
    xT = xT_ref[...]                                   # (D, bn), compute dtype

    # layer0 + Dropout(eval, identity) + ReLU   -- batch on the lane dim
    h1 = jnp.dot(w1t_ref[...], xT, preferred_element_type=jnp.float32)   # (H1, bn)
    h1 = jnp.maximum(h1 + b1_ref[...], 0.0).astype(wt)                   # f32 epilogue

    # layer1 + Dropout (identity) + ReLU
    h2 = jnp.dot(w2t_ref[...], h1, preferred_element_type=jnp.float32)   # (H2, bn)
    h2 = jnp.maximum(h2 + b2_ref[...], 0.0).astype(wt)

    # layer2 (H2 -> 1): lane-dense (1, bn) row directly.
    logits = jnp.dot(w3_ref[...], h2, preferred_element_type=jnp.float32)  # (1, bn)
    logits = logits + b3_ref[0]                         # scalar bias from SMEM

    o_ref[...] = jax.nn.sigmoid(logits).astype(o_ref.dtype)


def ffnn_forward(x, params, *, block_n=8192, compute_dtype=jnp.bfloat16):
    """x: (N, D) float -> (N, 1) float32 = sigmoid(3-layer ReLU MLP)  ('preds').

    params = (w1 (D,H1), b1 (1,H1), w2 (H1,H2), b2 (1,H2),
              w3 (1,H2)  [PyTorch layer2.weight row],  b3 (1,1) or (1,)).

    compute_dtype=jnp.bfloat16 (default) keeps f32 accumulation/epilogue but
    casts x/W operands -> results match the f32 reference to ~1e-2.
    Pass compute_dtype=jnp.float32 for ~1e-6 agreement.
    """
    w1, b1, w2, b2, w3, b3 = params
    N, D = x.shape
    H1 = w1.shape[1]
    H2 = w2.shape[1]

    cd = jnp.float32 if compute_dtype is None else compute_dtype

    # Batch tile: always a multiple of 128 so x loads and output stores stay
    # lane-dense (unmasked vst) even for small / tail N.  Cap bn so large N
    # keeps >= ~4 grid steps (megacore sharding on v7x, pipeline overlap).
    target = max(128, _round_up(-(-N // 4), 128))
    bn = min(_round_up(block_n, 128), target)
    n_pad = _round_up(N, bn)
    grid = (n_pad // bn,)

    # Transposed-activation layout: batch on the MXU N/lane dimension.
    xT = jnp.pad(x, ((0, n_pad - N), (0, 0))).T.astype(cd)          # (D, n_pad)
    w1t = w1.T.astype(cd)                                           # (H1, D)
    w2t = w2.T.astype(cd)                                           # (H2, H1)
    w3c = jnp.asarray(w3).astype(cd)                                # (1, H2) row
    b1c = jnp.asarray(b1).reshape(H1, 1).astype(jnp.float32)        # column bias
    b2c = jnp.asarray(b2).reshape(H2, 1).astype(jnp.float32)
    b3c = jnp.asarray(b3).reshape(-1).astype(jnp.float32)           # (1,) SMEM scalar

    out = pl.pallas_call(
        ffnn_kernel,
        out_shape=jax.ShapeDtypeStruct((1, n_pad), jnp.float32),
        grid_spec=pltpu.PrefetchScalarGridSpec(
            num_scalar_prefetch=0,
            grid=grid,
            in_specs=[
                pl.BlockSpec((D, bn), lambda i: (0, i)),      # xT tile (pipelined)
                pl.BlockSpec((H1, D), lambda i: (0, 0)),      # W1^T (resident)
                pl.BlockSpec((H1, 1), lambda i: (0, 0)),      # b1 column
                pl.BlockSpec((H2, H1), lambda i: (0, 0)),     # W2^T
                pl.BlockSpec((H2, 1), lambda i: (0, 0)),      # b2 column
                pl.BlockSpec((1, H2), lambda i: (0, 0)),      # W3 row
                pl.BlockSpec(memory_space=pltpu.MemorySpace.SMEM),  # b3 scalar
            ],
            out_specs=pl.BlockSpec((1, bn), lambda i: (0, i)),  # lane-dense row
        ),
        compiler_params=pltpu.CompilerParams(
            dimension_semantics=("parallel",),
        ),
    )(xT, w1t, b1c, w2t, b2c, w3c, b3c)

    return out.reshape(n_pad, 1)[:N]


def init_linear(key, fan_in, fan_out):
    """Deterministic init matching nn.Linear uniform(-1/sqrt(fan_in), ...).
    Returns W as (fan_in, fan_out) so the reference computes x @ W (== x @ W_pt.T)."""
    kw, kb = jax.random.split(key)
    bound = 1.0 / math.sqrt(fan_in)
    w = jax.random.uniform(kw, (fan_in, fan_out), jnp.float32, -bound, bound)
    b = jax.random.uniform(kb, (1, fan_out), jnp.float32, -bound, bound)
    return w, b


def reference_forward(x, params):
    w1, b1, w2, b2, w3, b3 = params      # w3 is the (1, H2) row
    h1 = jnp.maximum(x @ w1 + b1, 0.0)
    h2 = jnp.maximum(h1 @ w2 + b2, 0.0)
    return jax.nn.sigmoid(h2 @ w3.T + jnp.asarray(b3).reshape(1, 1))


if __name__ == "__main__":
    # Shapes consistent with ffnn_init: feat_dim=32, feat_embed_dim=32,
    # class_embed_dim=32, output_dim=1; ReLU activations, dropout in eval mode.
    D, H1, H2 = 32, 32, 32

    key = jax.random.PRNGKey(0)
    kx, k1, k2, k3, kx2 = jax.random.split(key, 5)

    w1, b1 = init_linear(k1, D, H1)
    w2, b2 = init_linear(k2, H1, H2)
    w3c, b3 = init_linear(k3, H2, 1)
    params = (w1, b1, w2, b2, w3c.T, b3)   # w3 stored as (1, H2) row

    # Small batch, strict-numerics f32 path (single grid step, bn padded to 128).
    x_small = jax.random.normal(kx, (8, D), jnp.float32)
    out_small = jax.block_until_ready(
        ffnn_forward(x_small, params, compute_dtype=jnp.float32))
    ref_small = reference_forward(x_small, params)
    assert out_small.shape == (8, 1)
    assert jnp.allclose(out_small, ref_small, atol=1e-5, rtol=1e-5), "f32 small-batch mismatch"

    # Larger batch: default bf16 operands, multi-step pipelined grid (>=4 steps)
    # with a non-divisible tail.  Looser tolerance documents the bf16 operand path.
    N2 = 3000
    x_big = jax.random.normal(kx2, (N2, D), jnp.float32)
    out_big = jax.block_until_ready(ffnn_forward(x_big, params))
    ref_big = reference_forward(x_big, params)
    assert out_big.shape == (N2, 1)
    assert jnp.allclose(out_big, ref_big, atol=2e-2, rtol=2e-2), "bf16 big-batch mismatch"

    # And the same big batch on the strict f32 path.
    out_big_f32 = jax.block_until_ready(
        ffnn_forward(x_big, params, compute_dtype=jnp.float32))
    assert jnp.allclose(out_big_f32, ref_big, atol=1e-5, rtol=1e-5), "f32 big-batch mismatch"

    print("KERNEL_OK")
</pallas_src>

<mosaic_0001>
module attributes {stable_mosaic.version = 11 : i64} {
  func.func @ffnn_kernel(%arg0: i32, %arg1: memref<32x128xf32, #tpu.memory_space<vmem>>, %arg2: memref<32x32xf32, #tpu.memory_space<vmem>>, %arg3: memref<32x1xf32, #tpu.memory_space<vmem>>, %arg4: memref<32x32xf32, #tpu.memory_space<vmem>>, %arg5: memref<32x1xf32, #tpu.memory_space<vmem>>, %arg6: memref<1x32xf32, #tpu.memory_space<vmem>>, %arg7: memref<1xf32, #tpu.memory_space<smem>>, %arg8: memref<1x128xf32, #tpu.memory_space<vmem>>) attributes {dimension_semantics = [#tpu.dimension_semantics<parallel>], iteration_bounds = array<i64: 1>, scalar_prefetch = 0 : i64, scratch_operands = 0 : i64, tpu.core_type = #tpu.core_type<tc>, window_params = [{transform_indices = @transform_0, window_bounds = array<i64: 32, 128>}, {pipeline_mode = #tpu.pipeline_mode<synchronous>, transform_indices = @transform_1, window_bounds = array<i64: 32, 32>}, {pipeline_mode = #tpu.pipeline_mode<synchronous>, transform_indices = @transform_2, window_bounds = array<i64: 32, 1>}, {pipeline_mode = #tpu.pipeline_mode<synchronous>, transform_indices = @transform_3, window_bounds = array<i64: 32, 32>}, {pipeline_mode = #tpu.pipeline_mode<synchronous>, transform_indices = @transform_4, window_bounds = array<i64: 32, 1>}, {pipeline_mode = #tpu.pipeline_mode<synchronous>, transform_indices = @transform_5, window_bounds = array<i64: 1, 32>}, {transform_indices = @transform_6, window_bounds = array<i64: 1>}, {transform_indices = @transform_7, window_bounds = array<i64: 1, 128>}]} {
    %c0 = arith.constant 0 : index
    %c0_0 = arith.constant 0 : index
    %0 = vector.load %arg1[%c0, %c0_0] : memref<32x128xf32, #tpu.memory_space<vmem>>, vector<32x128xf32>
    %c0_1 = arith.constant 0 : index
    %c0_2 = arith.constant 0 : index
    %1 = vector.load %arg2[%c0_1, %c0_2] : memref<32x32xf32, #tpu.memory_space<vmem>>, vector<32x32xf32>
    %cst = arith.constant dense<0.000000e+00> : vector<32x128xf32>
    %2 = tpu.matmul %1, %0, %cst {dimension_numbers = #tpu.dot_dimension_numbers<[1], [0], [0], [1], [0, 0, 1, 1], [], []>} : vector<32x32xf32>, vector<32x128xf32>, vector<32x128xf32> -> vector<32x128xf32>
    %c0_3 = arith.constant 0 : index
    %c0_4 = arith.constant 0 : index
    %3 = vector.load %arg3[%c0_3, %c0_4] : memref<32x1xf32, #tpu.memory_space<vmem>>, vector<32x1xf32>
    %4 = vector.broadcast %3 : vector<32x1xf32> to vector<32x128xf32>
    %5 = arith.addf %2, %4 : vector<32x128xf32>
    %cst_5 = arith.constant 0.000000e+00 : f32
    %6 = vector.broadcast %cst_5 : f32 to vector<32x128xf32>
    %7 = arith.maximumf %5, %6 : vector<32x128xf32>
    %c0_6 = arith.constant 0 : index
    %c0_7 = arith.constant 0 : index
    %8 = vector.load %arg4[%c0_6, %c0_7] : memref<32x32xf32, #tpu.memory_space<vmem>>, vector<32x32xf32>
    %cst_8 = arith.constant dense<0.000000e+00> : vector<32x128xf32>
    %9 = tpu.matmul %8, %7, %cst_8 {dimension_numbers = #tpu.dot_dimension_numbers<[1], [0], [0], [1], [0, 0, 1, 1], [], []>} : vector<32x32xf32>, vector<32x128xf32>, vector<32x128xf32> -> vector<32x128xf32>
    %c0_9 = arith.constant 0 : index
    %c0_10 = arith.constant 0 : index
    %10 = vector.load %arg5[%c0_9, %c0_10] : memref<32x1xf32, #tpu.memory_space<vmem>>, vector<32x1xf32>
    %11 = vector.broadcast %10 : vector<32x1xf32> to vector<32x128xf32>
    %12 = arith.addf %9, %11 : vector<32x128xf32>
    %cst_11 = arith.constant 0.000000e+00 : f32
    %13 = vector.broadcast %cst_11 : f32 to vector<32x128xf32>
    %14 = arith.maximumf %12, %13 : vector<32x128xf32>
    %c0_12 = arith.constant 0 : index
    %c0_13 = arith.constant 0 : index
    %15 = vector.load %arg6[%c0_12, %c0_13] : memref<1x32xf32, #tpu.memory_space<vmem>>, vector<1x32xf32>
    %cst_14 = arith.constant dense<0.000000e+00> : vector<1x128xf32>
    %16 = tpu.matmul %15, %14, %cst_14 {dimension_numbers = #tpu.dot_dimension_numbers<[1], [0], [0], [1], [0, 0, 1, 1], [], []>} : vector<1x32xf32>, vector<32x128xf32>, vector<1x128xf32> -> vector<1x128xf32>
    %c0_15 = arith.constant 0 : index
    %17 = memref.load %arg7[%c0_15] : memref<1xf32, #tpu.memory_space<smem>>
    %18 = vector.broadcast %17 : f32 to vector<1x128xf32>
    %19 = arith.addf %16, %18 : vector<1x128xf32>
    %20 = arith.negf %19 : vector<1x128xf32>
    %21 = math.exp %20 : vector<1x128xf32>
    %cst_16 = arith.constant 1.000000e+00 : f32
    %22 = vector.broadcast %cst_16 : f32 to vector<1x128xf32>
    %23 = arith.addf %22, %21 : vector<1x128xf32>
    %24 = arith.divf %22, %23 : vector<1x128xf32>
    %c0_17 = arith.constant 0 : index
    %c0_18 = arith.constant 0 : index
    %25 = vector.load %arg8[%c0_17, %c0_18] : memref<1x128xf32, #tpu.memory_space<vmem>>, vector<1x128xf32>
    tpu.vector_store %arg8[%c0_17, %c0_18], %24 {strides = array<i32>} : memref<1x128xf32, #tpu.memory_space<vmem>>, vector<1x128xf32>,
    return
  }
  func.func @transform_0(%arg0: i32) -> (i32, i32) {
    %c0_i32 = arith.constant 0 : i32
    %c0_i32_0 = arith.constant 0 : i32
    return %c0_i32, %arg0 : i32, i32
  }
  func.func @transform_1(%arg0: i32) -> (i32, i32) {
    %c0_i32 = arith.constant 0 : i32
    %c0_i32_0 = arith.constant 0 : i32
    %c0_i32_1 = arith.constant 0 : i32
    return %c0_i32, %c0_i32_0 : i32, i32
  }
  func.func @transform_2(%arg0: i32) -> (i32, i32) {
    %c0_i32 = arith.constant 0 : i32
    %c0_i32_0 = arith.constant 0 : i32
    %c0_i32_1 = arith.constant 0 : i32
    return %c0_i32, %c0_i32_0 : i32, i32
  }
  func.func @transform_3(%arg0: i32) -> (i32, i32) {
    %c0_i32 = arith.constant 0 : i32
    %c0_i32_0 = arith.constant 0 : i32
    %c0_i32_1 = arith.constant 0 : i32
    return %c0_i32, %c0_i32_0 : i32, i32
  }
  func.func @transform_4(%arg0: i32) -> (i32, i32) {
    %c0_i32 = arith.constant 0 : i32
    %c0_i32_0 = arith.constant 0 : i32
    %c0_i32_1 = arith.constant 0 : i32
    return %c0_i32, %c0_i32_0 : i32, i32
  }
  func.func @transform_5(%arg0: i32) -> (i32, i32) {
    %c0_i32 = arith.constant 0 : i32
    %c0_i32_0 = arith.constant 0 : i32
    %c0_i32_1 = arith.constant 0 : i32
    return %c0_i32, %c0_i32_0 : i32, i32
  }
  func.func @transform_6(%arg0: i32) -> i32 {
    %c0_i32 = arith.constant 0 : i32
    %c0_i32_0 = arith.constant 0 : i32
    return %c0_i32 : i32
  }
  func.func @transform_7(%arg0: i32) -> (i32, i32) {
    %c0_i32 = arith.constant 0 : i32
    %c0_i32_0 = arith.constant 0 : i32
    return %c0_i32, %arg0 : i32, i32
  }
}

</mosaic_0001>

<bundles_post_ra>
// kernel: tpu_custom_call.1
= control target key start
LH: loop header
LB: loop body
LE: loop exit
PB: predicated region body
PF: predicated region fallthrough
CT: control target
= control target key end

     0   :  { %13 = vsyncpa [#allocation4], 0  ;;  %s646_s0 = inlined_call_operand.vmem [shape: f32[32,128], index: 0, kind: input, shape index: {}]   ;;  %s647_s1 = inlined_call_operand.vmem [shape: f32[32,32], index: 1, kind: input, shape index: {}]   ;;  %s648_s2 = inlined_call_operand.vmem [shape: f32[32,1], index: 2, kind: input, shape index: {}]   ;;  %s649_s3 = inlined_call_operand.hbm [shape: f32[32,32], index: 3, kind: input, shape index: {}]   ;;  %s650_s4 = inlined_call_operand.vmem [shape: f32[32,1], index: 4, kind: input, shape index: {}]   ;;  %s651_s5 = inlined_call_operand.vmem [shape: f32[1,32], index: 5, kind: input, shape index: {}]   ;;  %s652_s6 = inlined_call_operand.<no memory space> [shape: f32[1], index: 6, kind: input, shape index: {}]   ;;  %s653_s7 = inlined_call_operand.hbm [shape: f32[1,128], index: 7, kind: output, shape index: {}]  }
   0x1   :  { %14 = vsyncpa [#allocation5], 0  ;;  %s530_s24 = smov [#allocation3]  }
   0x2   :  { %s26_s25 = sshll.u32 %s530_s24, 4  ;;  %s27_s25 = int_to_ptr.vmem [resolvable:$true] %s26_s25 }
   0x3   :  { %s494_s26 = scalar_lea.vmem %s27_s25, 512  ;;  %p499_p1 = scmp.lt.s32.totalorder %s27_s25, %s27_s25 }
   0x4   :  { %p495_p0 = scmp.ne.s32.totalorder %s27_s25, %s494_s26  ;;  %p500_p2 = scmp.lt.s32.totalorder %s494_s26, %s494_s26 }
   0x6   :  { %p501_p3 = por %p500_p2, %p499_p1 }
   0x8   :  { %p502_p4 = pnand %p501_p3, %p495_p0 }
   0xa   :  { %505 = shalt.err (!%p502_p4)
}
   0xb   :  { %s531_s27 = smov 128   ;;  %s532_s28 = smov 8  }
   0xc   :  { %32 = dma.hbm_to_vmem [thread:$0]  %s649_s3, 512, %s27_s25, [#allocation4], %s531_s27, %s531_s27, %s532_s28  }
   0xd   :  { %526 = dma.done.wait [#allocation4], 512  }
   0xe   :  { %527 = vsyncadd [#allocation4], 4294966784  ;;  %v533_v0 = vmov 0   ;;  %vm74_vm0 = vcmask 261120   ;;  %v45_v1 = vld [vmem:[%s646_s0 + $0x18] sm:$0xff]  ;;  %v44_v2 = vld [vmem:[%s646_s0 + $0x10] sm:$0xff]  ;;  %v307_v55 = vstv %s652_s6 }
   0xf   :  { %480 = vset.pattern.permute.xlu0 %v533_v0  ;;  %481 = vset.pattern.permute.xlu1 %v533_v0  ;;  %v46_v3 = vld [vmem:[%s647_s1] sm:$0xff]  ;;  %v43_v4 = vld [vmem:[%s646_s0 + $0x8] sm:$0xff]  ;;  %v53_v5 = vld [vmem:[%s648_s2 + $0x18] sm:$0xff]  ;;  %v534_v37 = vmov 0.0   ;;  %vm535_vm1 = vmmov 0   ;;  %s536_s15 = smov [#allocation6]  }
  0x10   :  { %434 = vmatprep.subr.mxu0 %v45_v1  ;;  %442 = vmatprep.mubr.msk.f32.mxu0 %vm74_vm0, %v46_v3  ;;  %v51_v6 = vld [vmem:[%s648_s2 + $0x8] sm:$0xff]  ;;  %v42_v7 = vld [vmem:[%s646_s0] sm:$0xff]  ;;  %v52_v8 = vld [vmem:[%s648_s2 + $0x10] sm:$0xff]  ;;  %s394_s16 = sshll.u32 %s536_s15, 4  ;;  %s395_s16 = int_to_ptr.vmem [resolvable:$true] %s394_s16 }
  0x11   :  { %435 = vmatpush3.msra.mxu0 %v45_v1  ;;  %71 = vperm.xlu0 %480, %v53_v5   ;;  %v50_v9 = vld [vmem:[%s648_s2] sm:$0xff]  ;;  %v47_v10 = vld [vmem:[%s647_s1 + $0x8] sm:$0xff]  ;;  %v48_v11 = vld [vmem:[%s647_s1 + $0x10] sm:$0xff]  ;;  %s510_s17 = scalar_lea.vmem %s395_s16, 32  ;;  %p511_p6 = scmp.lt.s32.totalorder %s395_s16, %s395_s16 }
  0x12   :  { %436 = vmatprep.subr.mxu0 %v44_v2  ;;  %61 = vperm.xlu1 %481, %v51_v6   ;;  %v183_v12 = vld [vmem:[%s650_s4 + $0x18] sm:$0xff]  ;;  %v182_v13 = vld [vmem:[%s650_s4 + $0x10] sm:$0xff]  ;;  %v181_v15 = vld [vmem:[%s650_s4 + $0x8] sm:$0xff] }
  0x13   :  { %437 = vmatpush3.msra.mxu0 %v44_v2  ;;  %v49_v14 = vld [vmem:[%s647_s1 + $0x18] sm:$0xff]  ;;  %v180_v16 = vld [vmem:[%s650_s4] sm:$0xff]  ;;  %v177_v34 = vld [vmem:[#allocation3 + $0x8] sm:$0xff] }
  0x14   :  { %438 = vmatprep.subr.mxu0 %v43_v4  ;;  %v176_v17 = vld [vmem:[#allocation3] sm:$0xff]  ;;  %v178_v35 = vld [vmem:[#allocation3 + $0x10] sm:$0xff]  ;;  %v179_v36 = vld [vmem:[#allocation3 + $0x18] sm:$0xff] }
  0x15   :  { %439 = vmatpush3.msra.mxu0 %v43_v4  ;;  %66 = vperm.xlu0 %480, %v52_v8   ;;  %v305_v54 = vld [vmem:[%s651_s5] sm:$0x1]  ;;  %s506_s5 = scalar_lea.vmem %s395_s16, 16 }
  0x16   :  { %440 = vmatprep.subr.mxu0 %v42_v7  ;;  %56 = vperm.xlu1 %481, %v50_v9   ;;  %p507_p5 = scmp.ne.s32.totalorder %s395_s16, %s506_s5  ;;  %p512_p7 = scmp.lt.s32.totalorder %s510_s17, %s506_s5 }
  0x17   :  { %441 = vmatpush3.msra.mxu0 %v42_v7  ;;  %456 = vmatprep.mubr.msk.f32.mxu1 %vm74_vm0, %v176_v17 }
  0x18   :  { %443 = vmatmul.mubr.msk.f32.vlgmr.msra.gmra.mxu0 %vm74_vm0, %v47_v10  ;;  %462 = vmatprep.subr.mxu0 %v534_v37  ;;  %p513_p8 = por %p512_p7, %p511_p6 }
  0x19   :  { %445 = vmatprep.mubr.msk.f32.mxu0 %vm74_vm0, %v48_v11  ;;  %201 = vperm.xlu0 %480, %v183_v12  }
  0x1a   :  { %196 = vperm.xlu1 %481, %v182_v13   ;;  %p514_p9 = pnand %p513_p8, %p507_p5 }
  0x1c   :  { %446 = vmatmul.mubr.msk.f32.gmra.mxu0 %vm74_vm0, %v49_v14 }
  0x1d   :  { %191 = vperm.xlu0 %480, %v181_v15   ;;  %470 = vmatprep.mubr.msk.f32.mxu0 %vm535_vm1, %v534_v37 }
  0x1e   :  { %186 = vperm.xlu1 %481, %v180_v16  }
  0x8c   :  { %v72_v18 = vpop.permute.xlu0 %71 }
  0x8d   :  { %v62_v20 = vpop.permute.xlu1 %61 }
  0x90   :  { %v67_v24 = vpop.permute.xlu0 %66 }
  0x91   :  { %v57_v29 = vpop.permute.xlu1 %56 }
  0x94   :  { %v202_v38 = vpop.permute.xlu0 %201 }
  0x95   :  { %v197_v40 = vpop.permute.xlu1 %196 }
  0x98   :  { %v192_v44 = vpop.permute.xlu0 %191 }
  0x99   :  { %v187_v49 = vpop.permute.xlu1 %186 }
  0xd8   :  { %v444_v19 = vpop.f32.mrf.mxu0 }
  0xd9   :  { %v159_v26 = vadd.f32 %v444_v19, %v62_v20 }
  0xda   :  { %v153_v21 = vpop.f32.mrf.mxu0 }
  0xdb   :  { %v154_v30 = vadd.f32 %v153_v21, %v57_v29  ;;  %v173_v32 = vmax.f32 %v159_v26, 0.0 }
  0xdc   :  { %v447_v22 = vpop.f32.mrf.mxu0 }
  0xdd   :  { %v169_v23 = vadd.f32 %v447_v22, %v72_v18  ;;  %v172_v33 = vmax.f32 %v154_v30, 0.0 }
  0xde   :  { %v163_v25 = vpop.f32.mrf.mxu0 }
  0xdf   :  { %v175_v27 = vmax.f32 %v169_v23, 0.0  ;;  %v164_v28 = vadd.f32 %v163_v25, %v67_v24 }
  0xe1   :  { %v174_v31 = vmax.f32 %v164_v28, 0.0  ;;  %448 = vmatprep.subr.mxu1 %v175_v27 }
  0xe2   :  { %449 = vmatpush3.msra.mxu1 %v175_v27 }
  0xe3   :  { %450 = vmatprep.subr.mxu1 %v174_v31 }
  0xe4   :  { %451 = vmatpush3.msra.mxu1 %v174_v31 }
  0xe5   :  { %452 = vmatprep.subr.mxu1 %v173_v32 }
  0xe6   :  { %453 = vmatpush3.msra.mxu1 %v173_v32 }
  0xe7   :  { %454 = vmatprep.subr.mxu1 %v172_v33 }
  0xe8   :  { %455 = vmatpush3.msra.mxu1 %v172_v33 }
  0xe9   :  { %457 = vmatmul.mubr.msk.f32.vlgmr.msra.gmra.mxu1 %vm74_vm0, %v177_v34 }
  0xea   :  { %459 = vmatprep.mubr.msk.f32.mxu1 %vm74_vm0, %v178_v35 }
  0xed   :  { %460 = vmatmul.mubr.msk.f32.gmra.mxu1 %vm74_vm0, %v179_v36 }
 0x1a9   :  { %v458_v39 = vpop.f32.mrf.mxu1 }
 0x1aa   :  { %v288_v46 = vadd.f32 %v458_v39, %v192_v44 }
 0x1ab   :  { %v282_v41 = vpop.f32.mrf.mxu1 }
 0x1ac   :  { %v283_v50 = vadd.f32 %v282_v41, %v187_v49  ;;  %v302_v52 = vmax.f32 %v288_v46, 0.0 }
 0x1ad   :  { %v461_v42 = vpop.f32.mrf.mxu1 }
 0x1ae   :  { %v298_v43 = vadd.f32 %v461_v42, %v202_v38  ;;  %v301_v53 = vmax.f32 %v283_v50, 0.0 }
 0x1af   :  { %v292_v45 = vpop.f32.mrf.mxu1 }
 0x1b0   :  { %v304_v47 = vmax.f32 %v298_v43, 0.0  ;;  %v293_v48 = vadd.f32 %v292_v45, %v197_v40 }
 0x1b2   :  { %v303_v51 = vmax.f32 %v293_v48, 0.0  ;;  %463 = vmatpush3.msra.mxu0 %v304_v47 }
 0x1b3   :  { %464 = vmatprep.subr.mxu0 %v534_v37 }
 0x1b4   :  { %465 = vmatpush3.msra.mxu0 %v303_v51 }
 0x1b5   :  { %466 = vmatprep.subr.mxu0 %v534_v37 }
 0x1b6   :  { %467 = vmatpush3.msra.mxu0 %v302_v52 }
 0x1b7   :  { %468 = vmatprep.subr.mxu0 %v534_v37 }
 0x1b8   :  { %469 = vmatpush3.msra.mxu0 %v301_v53 }
 0x1b9   :  { %471 = vmatmul.mubr.msk.f32.vlgmr.msra.gmra.mxu0 %vm74_vm0, %v305_v54 }
 0x279   :  { %v377_v56 = vpop.f32.mrf.mxu0 }
 0x27a   :  { %v378_v57 = vadd.f32 %v377_v56, %v307_v55 }
 0x27b   :  { %v472_v58 = vpop.f32.mrf.mxu0 }
 0x27c   :  { %v412_v59 = vmul.f32 -1.442695, %v378_v57 }
 0x27e   :  { %482 = vpow2.f32 %v412_v59 }
 0x28b   :  { %v483_v60 = vpop.eup %482 }
 0x28c   :  { %v384_v61 = vadd.f32 1.0, %v483_v60 }
 0x28e   :  { %484 = vrcp.f32 %v384_v61 }
 0x29b   :  { %v485_v62 = vpop.eup %484 }
 0x29c   :  { %387 = vst [vmem:[#allocation6] sm:$0x1] %v485_v62 }
 0x29d   :  { %517 = shalt.err (!%p514_p9)
}
 0x29e   :  { %397 = dma.vmem_to_hbm [thread:$0]  %s395_s16, 16, %s653_s7, [#allocation5]  }
 0x29f   :  { %528 = dma.done.wait [#allocation5], 16  }
 0x2a0   :  { %529 = vsyncadd [#allocation5], 4294967280 }
 0x2a1   :  { %401 = vsyncpa [#allocation4], 1 }
 0x2a2   :  { %402 = vsyncpa [#allocation5], 1 }

</bundles_post_ra>
